<compile_context>
chip_gen: v7x
topology: tpu7x:2x2x1
jax: 0.10.0
libtpu: 0.0.40
codegen_flags: <defaults>
</compile_context>

<pallas_src>
import functools

import jax
import jax.numpy as jnp
import numpy as np
from jax import lax
from jax.experimental import pallas as pl
from jax.experimental.pallas import tpu as pltpu


def _pick_batch_block(N, C_in, C_out, HW, itemsize=4, vmem_budget_bytes=8 << 20):
    """Images per grid step: amortize the ~0.35us per-step overhead, keep the
    double-buffered in+out blocks under the scoped-VMEM budget (16 MiB on v5e),
    and keep >= 2 grid steps when N >= 2 so both v7x TensorCores get work."""
    per_image = 2 * (C_in + C_out) * HW * itemsize      # double-buffered in+out
    max_nb = max(1, vmem_budget_bytes // per_image)
    cap = N if N < 2 else max(1, N // 2)
    nb = int(min(max_nb, cap, N))
    while N % nb:
        nb -= 1
    return nb


def _basic_conv2d_kernel(w_ref, sb_ref, m_ref, x_ref, o_ref, *,
                         C_in, C_out, H, W, Nb, use_mxu):
    """One block of Nb images per grid step.

    w_ref : VMEM  VPU path: (9*C_in, C_out, 1) f32, row index = t*C_in + ci
                  MXU path: (9, C_out, C_in)   f32
    sb_ref: VMEM (2, C_out, 1) f32   fused eval-mode BN scale / bias
    m_ref : VMEM (9, HW) f32         per-tap validity masks (zero padding)
    x_ref : VMEM (Nb, C_in, HW) f32  spatial flattened onto the lane axis
    o_ref : VMEM (Nb, C_out, HW)
    """
    HW = H * W
    scale = sb_ref[0]                               # (C_out, 1) - sublane axis
    bias = sb_ref[1]                                # (C_out, 1)

    for n in range(Nb):
        xf = x_ref[n]                               # (C_in, HW)
        acc = jnp.zeros((C_out, HW), jnp.float32)
        # Stream the 9 taps: roll (XLU) + mask (VPU) one plane at a time and
        # accumulate into the single full-tile accumulator; the 9 planes are
        # never all live in VMEM at once.
        for t in range(9):
            dy, dx = t // 3 - 1, t % 3 - 1
            # want plane[:, p] = xf[:, (p + dy*W + dx) mod HW]  (jnp.roll sign)
            shift = (-(dy * W + dx)) % HW
            plane = xf if shift == 0 else pltpu.roll(xf, shift=shift, axis=1)
            if t != 4:                              # center-tap mask is all ones
                plane = plane * m_ref[t:t + 1, :]
            if use_mxu:
                # im2col-per-tap matmul-accumulate on the MXU (production C).
                acc = acc + jnp.dot(w_ref[t], plane,
                                    preferred_element_type=jnp.float32)
            else:
                # Tiny channel counts: C_in outer-product FMAs per tap on the
                # VPU, each a full-density (C_out, HW) tile update.
                for ci in range(C_in):
                    acc = acc + w_ref[t * C_in + ci] * plane[ci:ci + 1, :]
        # Fused eval-mode BatchNorm (conv bias=False).  forward() never applies
        # self.relu, so no ReLU.  Single lane-dense full-tile store.
        o_ref[n] = (acc * scale + bias).astype(o_ref.dtype)


def basic_conv2d_pallas(x, params, *, stride=1, padding=1, dilation=1, eps=1e-5):
    """x: (N, C_in, H, W) float32.  Returns (N, C_out, H, W)."""
    N, C_in, H, W = x.shape
    w = params["weight"]                             # (C_out, C_in, 3, 3)
    C_out = w.shape[0]
    assert w.shape[1:] == (C_in, 3, 3) and stride == 1 and padding == 1 \
        and dilation == 1, "only the 3x3/stride=1/pad=1/dilation=1 config is implemented"
    HW = H * W

    # MXU path for production channel counts; VPU outer-product path for tiny C.
    use_mxu = (C_in * C_out) >= 1024

    x_flat = x.reshape(N, C_in, HW)                  # free row-major reshape

    # Tap-major weight layouts (resident in VMEM).
    if use_mxu:
        w2 = jnp.transpose(w, (2, 3, 0, 1)).reshape(9, C_out, C_in)
    else:
        # Trailing size-1 lane dim puts the C_out values on the sublane axis,
        # matching the (C_out, HW) accumulator rows -> no per-FMA relayout.
        w2 = jnp.transpose(w, (2, 3, 1, 0)).reshape(9 * C_in, C_out)[..., None]

    # Fold eval-mode BN into per-channel scale/bias (conv has no bias).
    scale = params["gamma"] / jnp.sqrt(params["running_var"] + eps)
    bias = params["beta"] - params["running_mean"] * scale
    sb = jnp.stack([scale, bias], axis=0)[..., None]  # (2, C_out, 1)

    # Per-tap validity masks: implement the zero padding and kill the roll
    # wrap-around.  Built once on the host (9*HW*4 bytes, resident in VMEM).
    hh, ww = np.meshgrid(np.arange(H), np.arange(W), indexing="ij")
    masks_np = np.zeros((9, HW), np.float32)
    for t in range(9):
        dy, dx = t // 3 - 1, t % 3 - 1
        valid = ((hh + dy >= 0) & (hh + dy < H) &
                 (ww + dx >= 0) & (ww + dx < W))
        masks_np[t] = valid.reshape(HW).astype(np.float32)
    masks = jnp.asarray(masks_np)

    Nb = _pick_batch_block(N, C_in, C_out, HW, itemsize=x.dtype.itemsize)
    grid = (N // Nb,)

    kernel = functools.partial(_basic_conv2d_kernel, C_in=C_in, C_out=C_out,
                               H=H, W=W, Nb=Nb, use_mxu=use_mxu)

    out_flat = pl.pallas_call(
        kernel,
        out_shape=jax.ShapeDtypeStruct((N, C_out, HW), x.dtype),
        grid=grid,
        in_specs=[
            pl.BlockSpec(w2.shape, lambda n: (0, 0, 0)),        # weights (resident)
            pl.BlockSpec((2, C_out, 1), lambda n: (0, 0, 0)),   # BN scale/bias
            pl.BlockSpec((9, HW), lambda n: (0, 0)),            # masks (resident)
            pl.BlockSpec((Nb, C_in, HW), lambda n: (n, 0, 0)),  # x
        ],
        out_specs=pl.BlockSpec((Nb, C_out, HW), lambda n: (n, 0, 0)),
        compiler_params=pltpu.CompilerParams(
            dimension_semantics=("parallel",)),
    )(w2, sb, masks, x_flat)

    return out_flat.reshape(N, C_out, H, W)


def basic_conv2d_reference(x, params, eps=1e-5):
    """Pure-JAX reference (NCHW), eval-mode BN, no ReLU (matches forward())."""
    y = lax.conv_general_dilated(
        x, params["weight"], window_strides=(1, 1), padding=((1, 1), (1, 1)),
        dimension_numbers=("NCHW", "OIHW", "NCHW"),
        precision=lax.Precision.HIGHEST)
    scale = params["gamma"] / jnp.sqrt(params["running_var"] + eps)
    y = (y - params["running_mean"][None, :, None, None]) * scale[None, :, None, None]
    y = y + params["beta"][None, :, None, None]
    return y


def init_params(key, in_ch, out_ch):
    ks = jax.random.split(key, 5)
    return {
        "weight": jax.random.normal(ks[0], (out_ch, in_ch, 3, 3), jnp.float32) * 0.2,
        "gamma": 1.0 + 0.1 * jax.random.normal(ks[1], (out_ch,), jnp.float32),
        "beta": 0.1 * jax.random.normal(ks[2], (out_ch,), jnp.float32),
        "running_mean": 0.1 * jax.random.normal(ks[3], (out_ch,), jnp.float32),
        "running_var": 1.0 + 0.1 * jax.random.uniform(ks[4], (out_ch,), jnp.float32),
    }


if __name__ == "__main__":
    key = jax.random.PRNGKey(0)
    k_x, k_p = jax.random.split(key)

    N, C_in, C_out, H, W = 2, 4, 8, 16, 16
    x = jax.random.normal(k_x, (N, C_in, H, W), jnp.float32)
    params = init_params(k_p, C_in, C_out)

    out = basic_conv2d_pallas(x, params)
    out = jax.block_until_ready(out)

    ref = jax.block_until_ready(basic_conv2d_reference(x, params))
    np.testing.assert_allclose(np.asarray(out), np.asarray(ref),
                               rtol=1e-4, atol=1e-5)
    print("KERNEL_OK")
</pallas_src>

<mosaic_0001>
module attributes {stable_mosaic.version = 11 : i64} {
  func.func @_basic_conv2d_kernel(%arg0: i32, %arg1: memref<36x8x1xf32, #tpu.memory_space<vmem>>, %arg2: memref<2x8x1xf32, #tpu.memory_space<vmem>>, %arg3: memref<9x256xf32, #tpu.memory_space<vmem>>, %arg4: memref<1x4x256xf32, #tpu.memory_space<vmem>>, %arg5: memref<1x8x256xf32, #tpu.memory_space<vmem>>) attributes {dimension_semantics = [#tpu.dimension_semantics<parallel>], iteration_bounds = array<i64: 2>, scalar_prefetch = 0 : i64, scratch_operands = 0 : i64, tpu.core_type = #tpu.core_type<tc>, window_params = [{pipeline_mode = #tpu.pipeline_mode<synchronous>, transform_indices = @transform_0, window_bounds = array<i64: 36, 8, 1>}, {pipeline_mode = #tpu.pipeline_mode<synchronous>, transform_indices = @transform_1, window_bounds = array<i64: 2, 8, 1>}, {pipeline_mode = #tpu.pipeline_mode<synchronous>, transform_indices = @transform_2, window_bounds = array<i64: 9, 256>}, {transform_indices = @transform_3, window_bounds = array<i64: 1, 4, 256>}, {transform_indices = @transform_4, window_bounds = array<i64: 1, 8, 256>}]} {
    %c0 = arith.constant 0 : index
    %c0_0 = arith.constant 0 : index
    %c0_1 = arith.constant 0 : index
    %0 = vector.load %arg2[%c0, %c0_0, %c0_1] : memref<2x8x1xf32, #tpu.memory_space<vmem>>, vector<1x8x1xf32>
    %1 = vector.shape_cast %0 : vector<1x8x1xf32> to vector<8x1xf32>
    %c1 = arith.constant 1 : index
    %c0_2 = arith.constant 0 : index
    %c0_3 = arith.constant 0 : index
    %2 = vector.load %arg2[%c1, %c0_2, %c0_3] : memref<2x8x1xf32, #tpu.memory_space<vmem>>, vector<1x8x1xf32>
    %3 = vector.shape_cast %2 : vector<1x8x1xf32> to vector<8x1xf32>
    %c0_4 = arith.constant 0 : index
    %c0_5 = arith.constant 0 : index
    %c0_6 = arith.constant 0 : index
    %4 = vector.load %arg4[%c0_4, %c0_5, %c0_6] : memref<1x4x256xf32, #tpu.memory_space<vmem>>, vector<1x4x256xf32>
    %5 = vector.shape_cast %4 : vector<1x4x256xf32> to vector<4x256xf32>
    %cst = arith.constant 0.000000e+00 : f32
    %6 = vector.broadcast %cst : f32 to vector<8x256xf32>
    %c17_i32 = arith.constant 17 : i32
    %7 = tpu.dynamic_rotate %5 by %c17_i32 dim 1 : vector<4x256xf32>, i32 -> vector<4x256xf32>
    %c0_7 = arith.constant 0 : index
    %c0_8 = arith.constant 0 : index
    %8 = vector.load %arg3[%c0_7, %c0_8] : memref<9x256xf32, #tpu.memory_space<vmem>>, vector<1x256xf32>
    %9 = vector.broadcast %8 : vector<1x256xf32> to vector<4x256xf32>
    %10 = arith.mulf %7, %9 : vector<4x256xf32>
    %c0_9 = arith.constant 0 : index
    %c0_10 = arith.constant 0 : index
    %c0_11 = arith.constant 0 : index
    %11 = vector.load %arg1[%c0_9, %c0_10, %c0_11] : memref<36x8x1xf32, #tpu.memory_space<vmem>>, vector<1x8x1xf32>
    %12 = vector.shape_cast %11 : vector<1x8x1xf32> to vector<8x1xf32>
    %13 = vector.extract_strided_slice %10 {offsets = [0, 0], sizes = [1, 256], strides = [1, 1]} : vector<4x256xf32> to vector<1x256xf32>
    %14 = vector.broadcast %12 : vector<8x1xf32> to vector<8x256xf32>
    %15 = vector.broadcast %13 : vector<1x256xf32> to vector<8x256xf32>
    %16 = arith.mulf %14, %15 : vector<8x256xf32>
    %17 = arith.addf %6, %16 : vector<8x256xf32>
    %c1_12 = arith.constant 1 : index
    %c0_13 = arith.constant 0 : index
    %c0_14 = arith.constant 0 : index
    %18 = vector.load %arg1[%c1_12, %c0_13, %c0_14] : memref<36x8x1xf32, #tpu.memory_space<vmem>>, vector<1x8x1xf32>
    %19 = vector.shape_cast %18 : vector<1x8x1xf32> to vector<8x1xf32>
    %20 = vector.extract_strided_slice %10 {offsets = [1, 0], sizes = [1, 256], strides = [1, 1]} : vector<4x256xf32> to vector<1x256xf32>
    %21 = vector.broadcast %19 : vector<8x1xf32> to vector<8x256xf32>
    %22 = vector.broadcast %20 : vector<1x256xf32> to vector<8x256xf32>
    %23 = arith.mulf %21, %22 : vector<8x256xf32>
    %24 = arith.addf %17, %23 : vector<8x256xf32>
    %c2 = arith.constant 2 : index
    %c0_15 = arith.constant 0 : index
    %c0_16 = arith.constant 0 : index
    %25 = vector.load %arg1[%c2, %c0_15, %c0_16] : memref<36x8x1xf32, #tpu.memory_space<vmem>>, vector<1x8x1xf32>
    %26 = vector.shape_cast %25 : vector<1x8x1xf32> to vector<8x1xf32>
    %27 = vector.extract_strided_slice %10 {offsets = [2, 0], sizes = [1, 256], strides = [1, 1]} : vector<4x256xf32> to vector<1x256xf32>
    %28 = vector.broadcast %26 : vector<8x1xf32> to vector<8x256xf32>
    %29 = vector.broadcast %27 : vector<1x256xf32> to vector<8x256xf32>
    %30 = arith.mulf %28, %29 : vector<8x256xf32>
    %31 = arith.addf %24, %30 : vector<8x256xf32>
    %c3 = arith.constant 3 : index
    %c0_17 = arith.constant 0 : index
    %c0_18 = arith.constant 0 : index
    %32 = vector.load %arg1[%c3, %c0_17, %c0_18] : memref<36x8x1xf32, #tpu.memory_space<vmem>>, vector<1x8x1xf32>
    %33 = vector.shape_cast %32 : vector<1x8x1xf32> to vector<8x1xf32>
    %34 = vector.extract_strided_slice %10 {offsets = [3, 0], sizes = [1, 256], strides = [1, 1]} : vector<4x256xf32> to vector<1x256xf32>
    %35 = vector.broadcast %33 : vector<8x1xf32> to vector<8x256xf32>
    %36 = vector.broadcast %34 : vector<1x256xf32> to vector<8x256xf32>
    %37 = arith.mulf %35, %36 : vector<8x256xf32>
    %38 = arith.addf %31, %37 : vector<8x256xf32>
    %c16_i32 = arith.constant 16 : i32
    %39 = tpu.dynamic_rotate %5 by %c16_i32 dim 1 : vector<4x256xf32>, i32 -> vector<4x256xf32>
    %c1_19 = arith.constant 1 : index
    %c0_20 = arith.constant 0 : index
    %40 = vector.load %arg3[%c1_19, %c0_20] : memref<9x256xf32, #tpu.memory_space<vmem>>, vector<1x256xf32>
    %41 = vector.broadcast %40 : vector<1x256xf32> to vector<4x256xf32>
    %42 = arith.mulf %39, %41 : vector<4x256xf32>
    %c4 = arith.constant 4 : index
    %c0_21 = arith.constant 0 : index
    %c0_22 = arith.constant 0 : index
    %43 = vector.load %arg1[%c4, %c0_21, %c0_22] : memref<36x8x1xf32, #tpu.memory_space<vmem>>, vector<1x8x1xf32>
    %44 = vector.shape_cast %43 : vector<1x8x1xf32> to vector<8x1xf32>
    %45 = vector.extract_strided_slice %42 {offsets = [0, 0], sizes = [1, 256], strides = [1, 1]} : vector<4x256xf32> to vector<1x256xf32>
    %46 = vector.broadcast %44 : vector<8x1xf32> to vector<8x256xf32>
    %47 = vector.broadcast %45 : vector<1x256xf32> to vector<8x256xf32>
    %48 = arith.mulf %46, %47 : vector<8x256xf32>
    %49 = arith.addf %38, %48 : vector<8x256xf32>
    %c5 = arith.constant 5 : index
    %c0_23 = arith.constant 0 : index
    %c0_24 = arith.constant 0 : index
    %50 = vector.load %arg1[%c5, %c0_23, %c0_24] : memref<36x8x1xf32, #tpu.memory_space<vmem>>, vector<1x8x1xf32>
    %51 = vector.shape_cast %50 : vector<1x8x1xf32> to vector<8x1xf32>
    %52 = vector.extract_strided_slice %42 {offsets = [1, 0], sizes = [1, 256], strides = [1, 1]} : vector<4x256xf32> to vector<1x256xf32>
    %53 = vector.broadcast %51 : vector<8x1xf32> to vector<8x256xf32>
    %54 = vector.broadcast %52 : vector<1x256xf32> to vector<8x256xf32>
    %55 = arith.mulf %53, %54 : vector<8x256xf32>
    %56 = arith.addf %49, %55 : vector<8x256xf32>
    %c6 = arith.constant 6 : index
    %c0_25 = arith.constant 0 : index
    %c0_26 = arith.constant 0 : index
    %57 = vector.load %arg1[%c6, %c0_25, %c0_26] : memref<36x8x1xf32, #tpu.memory_space<vmem>>, vector<1x8x1xf32>
    %58 = vector.shape_cast %57 : vector<1x8x1xf32> to vector<8x1xf32>
    %59 = vector.extract_strided_slice %42 {offsets = [2, 0], sizes = [1, 256], strides = [1, 1]} : vector<4x256xf32> to vector<1x256xf32>
    %60 = vector.broadcast %58 : vector<8x1xf32> to vector<8x256xf32>
    %61 = vector.broadcast %59 : vector<1x256xf32> to vector<8x256xf32>
    %62 = arith.mulf %60, %61 : vector<8x256xf32>
    %63 = arith.addf %56, %62 : vector<8x256xf32>
    %c7 = arith.constant 7 : index
    %c0_27 = arith.constant 0 : index
    %c0_28 = arith.constant 0 : index
    %64 = vector.load %arg1[%c7, %c0_27, %c0_28] : memref<36x8x1xf32, #tpu.memory_space<vmem>>, vector<1x8x1xf32>
    %65 = vector.shape_cast %64 : vector<1x8x1xf32> to vector<8x1xf32>
    %66 = vector.extract_strided_slice %42 {offsets = [3, 0], sizes = [1, 256], strides = [1, 1]} : vector<4x256xf32> to vector<1x256xf32>
    %67 = vector.broadcast %65 : vector<8x1xf32> to vector<8x256xf32>
    %68 = vector.broadcast %66 : vector<1x256xf32> to vector<8x256xf32>
    %69 = arith.mulf %67, %68 : vector<8x256xf32>
    %70 = arith.addf %63, %69 : vector<8x256xf32>
    %c15_i32 = arith.constant 15 : i32
    %71 = tpu.dynamic_rotate %5 by %c15_i32 dim 1 : vector<4x256xf32>, i32 -> vector<4x256xf32>
    %c2_29 = arith.constant 2 : index
    %c0_30 = arith.constant 0 : index
    %72 = vector.load %arg3[%c2_29, %c0_30] : memref<9x256xf32, #tpu.memory_space<vmem>>, vector<1x256xf32>
    %73 = vector.broadcast %72 : vector<1x256xf32> to vector<4x256xf32>
    %74 = arith.mulf %71, %73 : vector<4x256xf32>
    %c8 = arith.constant 8 : index
    %c0_31 = arith.constant 0 : index
    %c0_32 = arith.constant 0 : index
    %75 = vector.load %arg1[%c8, %c0_31, %c0_32] : memref<36x8x1xf32, #tpu.memory_space<vmem>>, vector<1x8x1xf32>
    %76 = vector.shape_cast %75 : vector<1x8x1xf32> to vector<8x1xf32>
    %77 = vector.extract_strided_slice %74 {offsets = [0, 0], sizes = [1, 256], strides = [1, 1]} : vector<4x256xf32> to vector<1x256xf32>
    %78 = vector.broadcast %76 : vector<8x1xf32> to vector<8x256xf32>
    %79 = vector.broadcast %77 : vector<1x256xf32> to vector<8x256xf32>
    %80 = arith.mulf %78, %79 : vector<8x256xf32>
    %81 = arith.addf %70, %80 : vector<8x256xf32>
    %c9 = arith.constant 9 : index
    %c0_33 = arith.constant 0 : index
    %c0_34 = arith.constant 0 : index
    %82 = vector.load %arg1[%c9, %c0_33, %c0_34] : memref<36x8x1xf32, #tpu.memory_space<vmem>>, vector<1x8x1xf32>
    %83 = vector.shape_cast %82 : vector<1x8x1xf32> to vector<8x1xf32>
    %84 = vector.extract_strided_slice %74 {offsets = [1, 0], sizes = [1, 256], strides = [1, 1]} : vector<4x256xf32> to vector<1x256xf32>
    %85 = vector.broadcast %83 : vector<8x1xf32> to vector<8x256xf32>
    %86 = vector.broadcast %84 : vector<1x256xf32> to vector<8x256xf32>
    %87 = arith.mulf %85, %86 : vector<8x256xf32>
    %88 = arith.addf %81, %87 : vector<8x256xf32>
    %c10 = arith.constant 10 : index
    %c0_35 = arith.constant 0 : index
    %c0_36 = arith.constant 0 : index
    %89 = vector.load %arg1[%c10, %c0_35, %c0_36] : memref<36x8x1xf32, #tpu.memory_space<vmem>>, vector<1x8x1xf32>
    %90 = vector.shape_cast %89 : vector<1x8x1xf32> to vector<8x1xf32>
    %91 = vector.extract_strided_slice %74 {offsets = [2, 0], sizes = [1, 256], strides = [1, 1]} : vector<4x256xf32> to vector<1x256xf32>
    %92 = vector.broadcast %90 : vector<8x1xf32> to vector<8x256xf32>
    %93 = vector.broadcast %91 : vector<1x256xf32> to vector<8x256xf32>
    %94 = arith.mulf %92, %93 : vector<8x256xf32>
    %95 = arith.addf %88, %94 : vector<8x256xf32>
    %c11 = arith.constant 11 : index
    %c0_37 = arith.constant 0 : index
    %c0_38 = arith.constant 0 : index
    %96 = vector.load %arg1[%c11, %c0_37, %c0_38] : memref<36x8x1xf32, #tpu.memory_space<vmem>>, vector<1x8x1xf32>
    %97 = vector.shape_cast %96 : vector<1x8x1xf32> to vector<8x1xf32>
    %98 = vector.extract_strided_slice %74 {offsets = [3, 0], sizes = [1, 256], strides = [1, 1]} : vector<4x256xf32> to vector<1x256xf32>
    %99 = vector.broadcast %97 : vector<8x1xf32> to vector<8x256xf32>
    %100 = vector.broadcast %98 : vector<1x256xf32> to vector<8x256xf32>
    %101 = arith.mulf %99, %100 : vector<8x256xf32>
    %102 = arith.addf %95, %101 : vector<8x256xf32>
    %c1_i32 = arith.constant 1 : i32
    %103 = tpu.dynamic_rotate %5 by %c1_i32 dim 1 : vector<4x256xf32>, i32 -> vector<4x256xf32>
    %c3_39 = arith.constant 3 : index
    %c0_40 = arith.constant 0 : index
    %104 = vector.load %arg3[%c3_39, %c0_40] : memref<9x256xf32, #tpu.memory_space<vmem>>, vector<1x256xf32>
    %105 = vector.broadcast %104 : vector<1x256xf32> to vector<4x256xf32>
    %106 = arith.mulf %103, %105 : vector<4x256xf32>
    %c12 = arith.constant 12 : index
    %c0_41 = arith.constant 0 : index
    %c0_42 = arith.constant 0 : index
    %107 = vector.load %arg1[%c12, %c0_41, %c0_42] : memref<36x8x1xf32, #tpu.memory_space<vmem>>, vector<1x8x1xf32>
    %108 = vector.shape_cast %107 : vector<1x8x1xf32> to vector<8x1xf32>
    %109 = vector.extract_strided_slice %106 {offsets = [0, 0], sizes = [1, 256], strides = [1, 1]} : vector<4x256xf32> to vector<1x256xf32>
    %110 = vector.broadcast %108 : vector<8x1xf32> to vector<8x256xf32>
    %111 = vector.broadcast %109 : vector<1x256xf32> to vector<8x256xf32>
    %112 = arith.mulf %110, %111 : vector<8x256xf32>
    %113 = arith.addf %102, %112 : vector<8x256xf32>
    %c13 = arith.constant 13 : index
    %c0_43 = arith.constant 0 : index
    %c0_44 = arith.constant 0 : index
    %114 = vector.load %arg1[%c13, %c0_43, %c0_44] : memref<36x8x1xf32, #tpu.memory_space<vmem>>, vector<1x8x1xf32>
    %115 = vector.shape_cast %114 : vector<1x8x1xf32> to vector<8x1xf32>
    %116 = vector.extract_strided_slice %106 {offsets = [1, 0], sizes = [1, 256], strides = [1, 1]} : vector<4x256xf32> to vector<1x256xf32>
    %117 = vector.broadcast %115 : vector<8x1xf32> to vector<8x256xf32>
    %118 = vector.broadcast %116 : vector<1x256xf32> to vector<8x256xf32>
    %119 = arith.mulf %117, %118 : vector<8x256xf32>
    %120 = arith.addf %113, %119 : vector<8x256xf32>
    %c14 = arith.constant 14 : index
    %c0_45 = arith.constant 0 : index
    %c0_46 = arith.constant 0 : index
    %121 = vector.load %arg1[%c14, %c0_45, %c0_46] : memref<36x8x1xf32, #tpu.memory_space<vmem>>, vector<1x8x1xf32>
    %122 = vector.shape_cast %121 : vector<1x8x1xf32> to vector<8x1xf32>
    %123 = vector.extract_strided_slice %106 {offsets = [2, 0], sizes = [1, 256], strides = [1, 1]} : vector<4x256xf32> to vector<1x256xf32>
    %124 = vector.broadcast %122 : vector<8x1xf32> to vector<8x256xf32>
    %125 = vector.broadcast %123 : vector<1x256xf32> to vector<8x256xf32>
    %126 = arith.mulf %124, %125 : vector<8x256xf32>
    %127 = arith.addf %120, %126 : vector<8x256xf32>
    %c15 = arith.constant 15 : index
    %c0_47 = arith.constant 0 : index
    %c0_48 = arith.constant 0 : index
    %128 = vector.load %arg1[%c15, %c0_47, %c0_48] : memref<36x8x1xf32, #tpu.memory_space<vmem>>, vector<1x8x1xf32>
    %129 = vector.shape_cast %128 : vector<1x8x1xf32> to vector<8x1xf32>
    %130 = vector.extract_strided_slice %106 {offsets = [3, 0], sizes = [1, 256], strides = [1, 1]} : vector<4x256xf32> to vector<1x256xf32>
    %131 = vector.broadcast %129 : vector<8x1xf32> to vector<8x256xf32>
    %132 = vector.broadcast %130 : vector<1x256xf32> to vector<8x256xf32>
    %133 = arith.mulf %131, %132 : vector<8x256xf32>
    %134 = arith.addf %127, %133 : vector<8x256xf32>
    %c16 = arith.constant 16 : index
    %c0_49 = arith.constant 0 : index
    %c0_50 = arith.constant 0 : index
    %135 = vector.load %arg1[%c16, %c0_49, %c0_50] : memref<36x8x1xf32, #tpu.memory_space<vmem>>, vector<1x8x1xf32>
    %136 = vector.shape_cast %135 : vector<1x8x1xf32> to vector<8x1xf32>
    %137 = vector.extract_strided_slice %5 {offsets = [0, 0], sizes = [1, 256], strides = [1, 1]} : vector<4x256xf32> to vector<1x256xf32>
    %138 = vector.broadcast %136 : vector<8x1xf32> to vector<8x256xf32>
    %139 = vector.broadcast %137 : vector<1x256xf32> to vector<8x256xf32>
    %140 = arith.mulf %138, %139 : vector<8x256xf32>
    %141 = arith.addf %134, %140 : vector<8x256xf32>
    %c17 = arith.constant 17 : index
    %c0_51 = arith.constant 0 : index
    %c0_52 = arith.constant 0 : index
    %142 = vector.load %arg1[%c17, %c0_51, %c0_52] : memref<36x8x1xf32, #tpu.memory_space<vmem>>, vector<1x8x1xf32>
    %143 = vector.shape_cast %142 : vector<1x8x1xf32> to vector<8x1xf32>
    %144 = vector.extract_strided_slice %5 {offsets = [1, 0], sizes = [1, 256], strides = [1, 1]} : vector<4x256xf32> to vector<1x256xf32>
    %145 = vector.broadcast %143 : vector<8x1xf32> to vector<8x256xf32>
    %146 = vector.broadcast %144 : vector<1x256xf32> to vector<8x256xf32>
    %147 = arith.mulf %145, %146 : vector<8x256xf32>
    %148 = arith.addf %141, %147 : vector<8x256xf32>
    %c18 = arith.constant 18 : index
    %c0_53 = arith.constant 0 : index
    %c0_54 = arith.constant 0 : index
    %149 = vector.load %arg1[%c18, %c0_53, %c0_54] : memref<36x8x1xf32, #tpu.memory_space<vmem>>, vector<1x8x1xf32>
    %150 = vector.shape_cast %149 : vector<1x8x1xf32> to vector<8x1xf32>
    %151 = vector.extract_strided_slice %5 {offsets = [2, 0], sizes = [1, 256], strides = [1, 1]} : vector<4x256xf32> to vector<1x256xf32>
    %152 = vector.broadcast %150 : vector<8x1xf32> to vector<8x256xf32>
    %153 = vector.broadcast %151 : vector<1x256xf32> to vector<8x256xf32>
    %154 = arith.mulf %152, %153 : vector<8x256xf32>
    %155 = arith.addf %148, %154 : vector<8x256xf32>
    %c19 = arith.constant 19 : index
    %c0_55 = arith.constant 0 : index
    %c0_56 = arith.constant 0 : index
    %156 = vector.load %arg1[%c19, %c0_55, %c0_56] : memref<36x8x1xf32, #tpu.memory_space<vmem>>, vector<1x8x1xf32>
    %157 = vector.shape_cast %156 : vector<1x8x1xf32> to vector<8x1xf32>
    %158 = vector.extract_strided_slice %5 {offsets = [3, 0], sizes = [1, 256], strides = [1, 1]} : vector<4x256xf32> to vector<1x256xf32>
    %159 = vector.broadcast %157 : vector<8x1xf32> to vector<8x256xf32>
    %160 = vector.broadcast %158 : vector<1x256xf32> to vector<8x256xf32>
    %161 = arith.mulf %159, %160 : vector<8x256xf32>
    %162 = arith.addf %155, %161 : vector<8x256xf32>
    %c255_i32 = arith.constant 255 : i32
    %163 = tpu.dynamic_rotate %5 by %c255_i32 dim 1 : vector<4x256xf32>, i32 -> vector<4x256xf32>
    %c5_57 = arith.constant 5 : index
    %c0_58 = arith.constant 0 : index
    %164 = vector.load %arg3[%c5_57, %c0_58] : memref<9x256xf32, #tpu.memory_space<vmem>>, vector<1x256xf32>
    %165 = vector.broadcast %164 : vector<1x256xf32> to vector<4x256xf32>
    %166 = arith.mulf %163, %165 : vector<4x256xf32>
    %c20 = arith.constant 20 : index
    %c0_59 = arith.constant 0 : index
    %c0_60 = arith.constant 0 : index
    %167 = vector.load %arg1[%c20, %c0_59, %c0_60] : memref<36x8x1xf32, #tpu.memory_space<vmem>>, vector<1x8x1xf32>
    %168 = vector.shape_cast %167 : vector<1x8x1xf32> to vector<8x1xf32>
    %169 = vector.extract_strided_slice %166 {offsets = [0, 0], sizes = [1, 256], strides = [1, 1]} : vector<4x256xf32> to vector<1x256xf32>
    %170 = vector.broadcast %168 : vector<8x1xf32> to vector<8x256xf32>
    %171 = vector.broadcast %169 : vector<1x256xf32> to vector<8x256xf32>
    %172 = arith.mulf %170, %171 : vector<8x256xf32>
    %173 = arith.addf %162, %172 : vector<8x256xf32>
    %c21 = arith.constant 21 : index
    %c0_61 = arith.constant 0 : index
    %c0_62 = arith.constant 0 : index
    %174 = vector.load %arg1[%c21, %c0_61, %c0_62] : memref<36x8x1xf32, #tpu.memory_space<vmem>>, vector<1x8x1xf32>
    %175 = vector.shape_cast %174 : vector<1x8x1xf32> to vector<8x1xf32>
    %176 = vector.extract_strided_slice %166 {offsets = [1, 0], sizes = [1, 256], strides = [1, 1]} : vector<4x256xf32> to vector<1x256xf32>
    %177 = vector.broadcast %175 : vector<8x1xf32> to vector<8x256xf32>
    %178 = vector.broadcast %176 : vector<1x256xf32> to vector<8x256xf32>
    %179 = arith.mulf %177, %178 : vector<8x256xf32>
    %180 = arith.addf %173, %179 : vector<8x256xf32>
    %c22 = arith.constant 22 : index
    %c0_63 = arith.constant 0 : index
    %c0_64 = arith.constant 0 : index
    %181 = vector.load %arg1[%c22, %c0_63, %c0_64] : memref<36x8x1xf32, #tpu.memory_space<vmem>>, vector<1x8x1xf32>
    %182 = vector.shape_cast %181 : vector<1x8x1xf32> to vector<8x1xf32>
    %183 = vector.extract_strided_slice %166 {offsets = [2, 0], sizes = [1, 256], strides = [1, 1]} : vector<4x256xf32> to vector<1x256xf32>
    %184 = vector.broadcast %182 : vector<8x1xf32> to vector<8x256xf32>
    %185 = vector.broadcast %183 : vector<1x256xf32> to vector<8x256xf32>
    %186 = arith.mulf %184, %185 : vector<8x256xf32>
    %187 = arith.addf %180, %186 : vector<8x256xf32>
    %c23 = arith.constant 23 : index
    %c0_65 = arith.constant 0 : index
    %c0_66 = arith.constant 0 : index
    %188 = vector.load %arg1[%c23, %c0_65, %c0_66] : memref<36x8x1xf32, #tpu.memory_space<vmem>>, vector<1x8x1xf32>
    %189 = vector.shape_cast %188 : vector<1x8x1xf32> to vector<8x1xf32>
    %190 = vector.extract_strided_slice %166 {offsets = [3, 0], sizes = [1, 256], strides = [1, 1]} : vector<4x256xf32> to vector<1x256xf32>
    %191 = vector.broadcast %189 : vector<8x1xf32> to vector<8x256xf32>
    %192 = vector.broadcast %190 : vector<1x256xf32> to vector<8x256xf32>
    %193 = arith.mulf %191, %192 : vector<8x256xf32>
    %194 = arith.addf %187, %193 : vector<8x256xf32>
    %c241_i32 = arith.constant 241 : i32
    %195 = tpu.dynamic_rotate %5 by %c241_i32 dim 1 : vector<4x256xf32>, i32 -> vector<4x256xf32>
    %c6_67 = arith.constant 6 : index
    %c0_68 = arith.constant 0 : index
    %196 = vector.load %arg3[%c6_67, %c0_68] : memref<9x256xf32, #tpu.memory_space<vmem>>, vector<1x256xf32>
    %197 = vector.broadcast %196 : vector<1x256xf32> to vector<4x256xf32>
    %198 = arith.mulf %195, %197 : vector<4x256xf32>
    %c24 = arith.constant 24 : index
    %c0_69 = arith.constant 0 : index
    %c0_70 = arith.constant 0 : index
    %199 = vector.load %arg1[%c24, %c0_69, %c0_70] : memref<36x8x1xf32, #tpu.memory_space<vmem>>, vector<1x8x1xf32>
    %200 = vector.shape_cast %199 : vector<1x8x1xf32> to vector<8x1xf32>
    %201 = vector.extract_strided_slice %198 {offsets = [0, 0], sizes = [1, 256], strides = [1, 1]} : vector<4x256xf32> to vector<1x256xf32>
    %202 = vector.broadcast %200 : vector<8x1xf32> to vector<8x256xf32>
    %203 = vector.broadcast %201 : vector<1x256xf32> to vector<8x256xf32>
    %204 = arith.mulf %202, %203 : vector<8x256xf32>
    %205 = arith.addf %194, %204 : vector<8x256xf32>
    %c25 = arith.constant 25 : index
    %c0_71 = arith.constant 0 : index
    %c0_72 = arith.constant 0 : index
    %206 = vector.load %arg1[%c25, %c0_71, %c0_72] : memref<36x8x1xf32, #tpu.memory_space<vmem>>, vector<1x8x1xf32>
    %207 = vector.shape_cast %206 : vector<1x8x1xf32> to vector<8x1xf32>
    %208 = vector.extract_strided_slice %198 {offsets = [1, 0], sizes = [1, 256], strides = [1, 1]} : vector<4x256xf32> to vector<1x256xf32>
    %209 = vector.broadcast %207 : vector<8x1xf32> to vector<8x256xf32>
    %210 = vector.broadcast %208 : vector<1x256xf32> to vector<8x256xf32>
    %211 = arith.mulf %209, %210 : vector<8x256xf32>
    %212 = arith.addf %205, %211 : vector<8x256xf32>
    %c26 = arith.constant 26 : index
    %c0_73 = arith.constant 0 : index
    %c0_74 = arith.constant 0 : index
    %213 = vector.load %arg1[%c26, %c0_73, %c0_74] : memref<36x8x1xf32, #tpu.memory_space<vmem>>, vector<1x8x1xf32>
    %214 = vector.shape_cast %213 : vector<1x8x1xf32> to vector<8x1xf32>
    %215 = vector.extract_strided_slice %198 {offsets = [2, 0], sizes = [1, 256], strides = [1, 1]} : vector<4x256xf32> to vector<1x256xf32>
    %216 = vector.broadcast %214 : vector<8x1xf32> to vector<8x256xf32>
    %217 = vector.broadcast %215 : vector<1x256xf32> to vector<8x256xf32>
    %218 = arith.mulf %216, %217 : vector<8x256xf32>
    %219 = arith.addf %212, %218 : vector<8x256xf32>
    %c27 = arith.constant 27 : index
    %c0_75 = arith.constant 0 : index
    %c0_76 = arith.constant 0 : index
    %220 = vector.load %arg1[%c27, %c0_75, %c0_76] : memref<36x8x1xf32, #tpu.memory_space<vmem>>, vector<1x8x1xf32>
    %221 = vector.shape_cast %220 : vector<1x8x1xf32> to vector<8x1xf32>
    %222 = vector.extract_strided_slice %198 {offsets = [3, 0], sizes = [1, 256], strides = [1, 1]} : vector<4x256xf32> to vector<1x256xf32>
    %223 = vector.broadcast %221 : vector<8x1xf32> to vector<8x256xf32>
    %224 = vector.broadcast %222 : vector<1x256xf32> to vector<8x256xf32>
    %225 = arith.mulf %223, %224 : vector<8x256xf32>
    %226 = arith.addf %219, %225 : vector<8x256xf32>
    %c240_i32 = arith.constant 240 : i32
    %227 = tpu.dynamic_rotate %5 by %c240_i32 dim 1 : vector<4x256xf32>, i32 -> vector<4x256xf32>
    %c7_77 = arith.constant 7 : index
    %c0_78 = arith.constant 0 : index
    %228 = vector.load %arg3[%c7_77, %c0_78] : memref<9x256xf32, #tpu.memory_space<vmem>>, vector<1x256xf32>
    %229 = vector.broadcast %228 : vector<1x256xf32> to vector<4x256xf32>
    %230 = arith.mulf %227, %229 : vector<4x256xf32>
    %c28 = arith.constant 28 : index
    %c0_79 = arith.constant 0 : index
    %c0_80 = arith.constant 0 : index
    %231 = vector.load %arg1[%c28, %c0_79, %c0_80] : memref<36x8x1xf32, #tpu.memory_space<vmem>>, vector<1x8x1xf32>
    %232 = vector.shape_cast %231 : vector<1x8x1xf32> to vector<8x1xf32>
    %233 = vector.extract_strided_slice %230 {offsets = [0, 0], sizes = [1, 256], strides = [1, 1]} : vector<4x256xf32> to vector<1x256xf32>
    %234 = vector.broadcast %232 : vector<8x1xf32> to vector<8x256xf32>
    %235 = vector.broadcast %233 : vector<1x256xf32> to vector<8x256xf32>
    %236 = arith.mulf %234, %235 : vector<8x256xf32>
    %237 = arith.addf %226, %236 : vector<8x256xf32>
    %c29 = arith.constant 29 : index
    %c0_81 = arith.constant 0 : index
    %c0_82 = arith.constant 0 : index
    %238 = vector.load %arg1[%c29, %c0_81, %c0_82] : memref<36x8x1xf32, #tpu.memory_space<vmem>>, vector<1x8x1xf32>
    %239 = vector.shape_cast %238 : vector<1x8x1xf32> to vector<8x1xf32>
    %240 = vector.extract_strided_slice %230 {offsets = [1, 0], sizes = [1, 256], strides = [1, 1]} : vector<4x256xf32> to vector<1x256xf32>
    %241 = vector.broadcast %239 : vector<8x1xf32> to vector<8x256xf32>
    %242 = vector.broadcast %240 : vector<1x256xf32> to vector<8x256xf32>
    %243 = arith.mulf %241, %242 : vector<8x256xf32>
    %244 = arith.addf %237, %243 : vector<8x256xf32>
    %c30 = arith.constant 30 : index
    %c0_83 = arith.constant 0 : index
    %c0_84 = arith.constant 0 : index
    %245 = vector.load %arg1[%c30, %c0_83, %c0_84] : memref<36x8x1xf32, #tpu.memory_space<vmem>>, vector<1x8x1xf32>
    %246 = vector.shape_cast %245 : vector<1x8x1xf32> to vector<8x1xf32>
    %247 = vector.extract_strided_slice %230 {offsets = [2, 0], sizes = [1, 256], strides = [1, 1]} : vector<4x256xf32> to vector<1x256xf32>
    %248 = vector.broadcast %246 : vector<8x1xf32> to vector<8x256xf32>
    %249 = vector.broadcast %247 : vector<1x256xf32> to vector<8x256xf32>
    %250 = arith.mulf %248, %249 : vector<8x256xf32>
    %251 = arith.addf %244, %250 : vector<8x256xf32>
    %c31 = arith.constant 31 : index
    %c0_85 = arith.constant 0 : index
    %c0_86 = arith.constant 0 : index
    %252 = vector.load %arg1[%c31, %c0_85, %c0_86] : memref<36x8x1xf32, #tpu.memory_space<vmem>>, vector<1x8x1xf32>
    %253 = vector.shape_cast %252 : vector<1x8x1xf32> to vector<8x1xf32>
    %254 = vector.extract_strided_slice %230 {offsets = [3, 0], sizes = [1, 256], strides = [1, 1]} : vector<4x256xf32> to vector<1x256xf32>
    %255 = vector.broadcast %253 : vector<8x1xf32> to vector<8x256xf32>
    %256 = vector.broadcast %254 : vector<1x256xf32> to vector<8x256xf32>
    %257 = arith.mulf %255, %256 : vector<8x256xf32>
    %258 = arith.addf %251, %257 : vector<8x256xf32>
    %c239_i32 = arith.constant 239 : i32
    %259 = tpu.dynamic_rotate %5 by %c239_i32 dim 1 : vector<4x256xf32>, i32 -> vector<4x256xf32>
    %c8_87 = arith.constant 8 : index
    %c0_88 = arith.constant 0 : index
    %260 = vector.load %arg3[%c8_87, %c0_88] : memref<9x256xf32, #tpu.memory_space<vmem>>, vector<1x256xf32>
    %261 = vector.broadcast %260 : vector<1x256xf32> to vector<4x256xf32>
    %262 = arith.mulf %259, %261 : vector<4x256xf32>
    %c32 = arith.constant 32 : index
    %c0_89 = arith.constant 0 : index
    %c0_90 = arith.constant 0 : index
    %263 = vector.load %arg1[%c32, %c0_89, %c0_90] : memref<36x8x1xf32, #tpu.memory_space<vmem>>, vector<1x8x1xf32>
    %264 = vector.shape_cast %263 : vector<1x8x1xf32> to vector<8x1xf32>
    %265 = vector.extract_strided_slice %262 {offsets = [0, 0], sizes = [1, 256], strides = [1, 1]} : vector<4x256xf32> to vector<1x256xf32>
    %266 = vector.broadcast %264 : vector<8x1xf32> to vector<8x256xf32>
    %267 = vector.broadcast %265 : vector<1x256xf32> to vector<8x256xf32>
    %268 = arith.mulf %266, %267 : vector<8x256xf32>
    %269 = arith.addf %258, %268 : vector<8x256xf32>
    %c33 = arith.constant 33 : index
    %c0_91 = arith.constant 0 : index
    %c0_92 = arith.constant 0 : index
    %270 = vector.load %arg1[%c33, %c0_91, %c0_92] : memref<36x8x1xf32, #tpu.memory_space<vmem>>, vector<1x8x1xf32>
    %271 = vector.shape_cast %270 : vector<1x8x1xf32> to vector<8x1xf32>
    %272 = vector.extract_strided_slice %262 {offsets = [1, 0], sizes = [1, 256], strides = [1, 1]} : vector<4x256xf32> to vector<1x256xf32>
    %273 = vector.broadcast %271 : vector<8x1xf32> to vector<8x256xf32>
    %274 = vector.broadcast %272 : vector<1x256xf32> to vector<8x256xf32>
    %275 = arith.mulf %273, %274 : vector<8x256xf32>
    %276 = arith.addf %269, %275 : vector<8x256xf32>
    %c34 = arith.constant 34 : index
    %c0_93 = arith.constant 0 : index
    %c0_94 = arith.constant 0 : index
    %277 = vector.load %arg1[%c34, %c0_93, %c0_94] : memref<36x8x1xf32, #tpu.memory_space<vmem>>, vector<1x8x1xf32>
    %278 = vector.shape_cast %277 : vector<1x8x1xf32> to vector<8x1xf32>
    %279 = vector.extract_strided_slice %262 {offsets = [2, 0], sizes = [1, 256], strides = [1, 1]} : vector<4x256xf32> to vector<1x256xf32>
    %280 = vector.broadcast %278 : vector<8x1xf32> to vector<8x256xf32>
    %281 = vector.broadcast %279 : vector<1x256xf32> to vector<8x256xf32>
    %282 = arith.mulf %280, %281 : vector<8x256xf32>
    %283 = arith.addf %276, %282 : vector<8x256xf32>
    %c35 = arith.constant 35 : index
    %c0_95 = arith.constant 0 : index
    %c0_96 = arith.constant 0 : index
    %284 = vector.load %arg1[%c35, %c0_95, %c0_96] : memref<36x8x1xf32, #tpu.memory_space<vmem>>, vector<1x8x1xf32>
    %285 = vector.shape_cast %284 : vector<1x8x1xf32> to vector<8x1xf32>
    %286 = vector.extract_strided_slice %262 {offsets = [3, 0], sizes = [1, 256], strides = [1, 1]} : vector<4x256xf32> to vector<1x256xf32>
    %287 = vector.broadcast %285 : vector<8x1xf32> to vector<8x256xf32>
    %288 = vector.broadcast %286 : vector<1x256xf32> to vector<8x256xf32>
    %289 = arith.mulf %287, %288 : vector<8x256xf32>
    %290 = arith.addf %283, %289 : vector<8x256xf32>
    %291 = vector.broadcast %1 : vector<8x1xf32> to vector<8x256xf32>
    %292 = arith.mulf %290, %291 : vector<8x256xf32>
    %293 = vector.broadcast %3 : vector<8x1xf32> to vector<8x256xf32>
    %294 = arith.addf %292, %293 : vector<8x256xf32>
    %c0_97 = arith.constant 0 : index
    %c0_98 = arith.constant 0 : index
    %c0_99 = arith.constant 0 : index
    %295 = vector.load %arg5[%c0_97, %c0_98, %c0_99] : memref<1x8x256xf32, #tpu.memory_space<vmem>>, vector<1x8x256xf32>
    %296 = vector.shape_cast %295 : vector<1x8x256xf32> to vector<8x256xf32>
    %297 = vector.shape_cast %294 : vector<8x256xf32> to vector<1x8x256xf32>
    tpu.vector_store %arg5[%c0_97, %c0_98, %c0_99], %297 {strides = array<i32>} : memref<1x8x256xf32, #tpu.memory_space<vmem>>, vector<1x8x256xf32>,
    return
  }
  func.func @transform_0(%arg0: i32) -> (i32, i32, i32) {
    %c0_i32 = arith.constant 0 : i32
    %c0_i32_0 = arith.constant 0 : i32
    %c0_i32_1 = arith.constant 0 : i32
    %c0_i32_2 = arith.constant 0 : i32
    return %c0_i32, %c0_i32_0, %c0_i32_1 : i32, i32, i32
  }
  func.func @transform_1(%arg0: i32) -> (i32, i32, i32) {
    %c0_i32 = arith.constant 0 : i32
    %c0_i32_0 = arith.constant 0 : i32
    %c0_i32_1 = arith.constant 0 : i32
    %c0_i32_2 = arith.constant 0 : i32
    return %c0_i32, %c0_i32_0, %c0_i32_1 : i32, i32, i32
  }
  func.func @transform_2(%arg0: i32) -> (i32, i32) {
    %c0_i32 = arith.constant 0 : i32
    %c0_i32_0 = arith.constant 0 : i32
    %c0_i32_1 = arith.constant 0 : i32
    return %c0_i32, %c0_i32_0 : i32, i32
  }
  func.func @transform_3(%arg0: i32) -> (i32, i32, i32) {
    %c0_i32 = arith.constant 0 : i32
    %c0_i32_0 = arith.constant 0 : i32
    %c0_i32_1 = arith.constant 0 : i32
    return %arg0, %c0_i32, %c0_i32_0 : i32, i32, i32
  }
  func.func @transform_4(%arg0: i32) -> (i32, i32, i32) {
    %c0_i32 = arith.constant 0 : i32
    %c0_i32_0 = arith.constant 0 : i32
    %c0_i32_1 = arith.constant 0 : i32
    return %arg0, %c0_i32, %c0_i32_0 : i32, i32, i32
  }
}

</mosaic_0001>

<bundles_post_ra>
// kernel: tpu_custom_call.1
= control target key start
LH: loop header
LB: loop body
LE: loop exit
PB: predicated region body
PF: predicated region fallthrough
CT: control target
= control target key end

     0   :  { %9 = vsyncpa [#allocation3], 0  ;;  %s1792_s0 = inlined_call_operand.vmem [shape: f32[36,8,1], index: 0, kind: input, shape index: {}]   ;;  %s1793_s1 = inlined_call_operand.vmem [shape: f32[2,8,1], index: 1, kind: input, shape index: {}]   ;;  %s1794_s2 = inlined_call_operand.vmem [shape: f32[9,256], index: 2, kind: input, shape index: {}]   ;;  %s1795_s3 = inlined_call_operand.vmem [shape: f32[2,4,256], index: 3, kind: input, shape index: {}]   ;;  %s1796_s4 = inlined_call_operand.hbm [shape: f32[2,8,256], index: 4, kind: output, shape index: {}]  }
   0x1   :  { %11 = vsyncpa [#allocation3 + $0x1], 0  ;;  %s1400_s15 = smov 0   ;;  %s1402_s16 = smov 0  }
   0x2   :  { %s1404_s17 = smov 0   ;;  %s1406_s18 = smov 0  }
   0x3 LB: > { %s1421_s19 = sadd.s32 4294967295, %s1363_s18   ;;  %s1193_s20 = sadd.s32 4294967294, %s1363_s18   ;;  %s1363_s18 = sphi %s1406_s18, %s1802_s18   ;;  %s1359_s17 = sphi %s1404_s17, %s1801_s17   ;;  %s1355_s16 = sphi %s1402_s16, %s1800_s16   ;;  %s1351_s15 = sphi %s1400_s15, %s1799_s15  }
   0x4   : > { %s1425_s21 = sadd.s32 1, %s1363_s18   ;;  %s113_s22 = sadd.s32 1, %s1359_s17 }
   0x5   : > { %s110_s23 = ssub.s32 %s1363_s18, %s1425_s21  ;;  %p123_p0 = scmp.ne.s32.totalorder %s1359_s17, %s1355_s16 }
   0x6   : > { %p111_p1 = scmp.eq.s32.totalorder %s110_s23, 0  ;;  %p124_p2 = scmp.eq.s32.totalorder %s1421_s19, 1 }
   0x7   : > { %p129_p3 = scmp.ne.s32.totalorder %s1355_s16, %s1351_s15  ;;  %p130_p4 = scmp.eq.s32.totalorder %s1193_s20, 1 }
   0x8   : > { %s1436_s24 = scalar_select %p111_p1, %s1359_s17, %s113_s22  }
   0x9   : > { %p1438_p5 = por %p124_p2, %p123_p0  ;;  %p1442_p6 = por %p130_p4, %p129_p3 }
   0xa   : > { %p1196_p7 = scmp.ge.s32.totalorder %s1363_s18, 1  ;;  %p165_p8 = scmp.lt.s32.totalorder %s1363_s18, 3 }
   0xc   : > { %p166_p9 = pnand %p1196_p7, %p165_p8 }
   0xd   : > { %v226_v0 = vld [vmem:[%s1792_s0] sm:$0xff] (!%p166_p9)  ;;  %p191_p10 = scmp.lt.s32.totalorder (!%p166_p9), %s1421_s19, 1  ;;  %v1365_v1 = vmov (!%p166_p9), 0   ;;  %v1201_v2 = vld [vmem:[%s1792_s0 + $0x8] sm:$0xff] (!%p166_p9)  ;;  %s1366_s10 = smov (!%p166_p9), 17   ;;  %v1203_v4 = vld [vmem:[%s1792_s0 + $0x18] sm:$0xff] (!%p166_p9)  ;;  %v207_v41 = vlaneseq (!%p166_p9) }
   0xe   : > { %169 = sbr.rel (%p166_p9) target bundleno = 279 (0x117), region = 36  ;;  %1298 = vset.pattern.permute.xlu1 (!%p166_p9), %v1365_v1  ;;  %1299 = vset.pattern.permute.xlu0 (!%p166_p9), %v1365_v1  ;;  %v1202_v6 = vld [vmem:[%s1792_s0 + $0x10] sm:$0xff] (!%p166_p9)  ;;  %s1367_s20 = smov (!%p166_p9), 16   ;;  %v1205_v7 = vld [vmem:[%s1792_s0 + $0x20] sm:$0xff] (!%p166_p9)  ;;  %v1206_v9 = vld [vmem:[%s1792_s0 + $0x28] sm:$0xff] (!%p166_p9) }
   0xf   : > { %229 = vperm.xlu1 (!%p166_p9), %1298, %v226_v0   ;;  %v1207_v8 = vld [vmem:[%s1792_s0 + $0x30] sm:$0xff] (!%p166_p9)  ;;  %v1208_v10 = vld [vmem:[%s1792_s0 + $0x38] sm:$0xff] (!%p166_p9)  ;;  %s1368_s7 = smov (!%p166_p9), 15   ;;  %v1210_v11 = vld [vmem:[%s1792_s0 + $0x40] sm:$0xff] (!%p166_p9)  ;;  %s1369_s22 = smov (!%p166_p9), 1   ;;  %v1589_v43 = vshrl.u32 (!%p166_p9), %v207_v41, 7 }
  0x10   : > { %v1212_v12 = vld [vmem:[%s1792_s0 + $0x50] sm:$0xff] (!%p166_p9)  ;;  %v1211_v13 = vld [vmem:[%s1792_s0 + $0x48] sm:$0xff] (!%p166_p9)  ;;  %v1213_v14 = vld [vmem:[%s1792_s0 + $0x58] sm:$0xff] (!%p166_p9)  ;;  %s1370_s27 = smov (!%p166_p9), 127   ;;  %s1372_s28 = smov (!%p166_p9), 112   ;;  %v1591_v44 = vand.u32 (!%p166_p9), 127, %v207_v41 }
  0x11   : > { %v1215_v15 = vld [vmem:[%s1792_s0 + $0x60] sm:$0xff] (!%p166_p9)  ;;  %v1217_v16 = vld [vmem:[%s1792_s0 + $0x70] sm:$0xff] (!%p166_p9)  ;;  %v1216_v17 = vld [vmem:[%s1792_s0 + $0x68] sm:$0xff] (!%p166_p9)  ;;  %s1373_s11 = smov (!%p166_p9), 111   ;;  %v1594_v45 = vsub.s32 (!%p166_p9), 0, %v1589_v43  ;;  %v1597_v46 = vsub.s32 (!%p166_p9), 1, %v1589_v43 }
  0x12   : > { %v1219_v18 = vld [vmem:[%s1792_s0 + $0x80] sm:$0xff] (!%p166_p9)  ;;  %v1218_v19 = vld [vmem:[%s1792_s0 + $0x78] sm:$0xff] (!%p166_p9)  ;;  %v1221_v20 = vld [vmem:[%s1792_s0 + $0x90] sm:$0xff] (!%p166_p9)  ;;  %vm209_vm0 = vcmp.lt.s32.totalorder (!%p166_p9), %v1591_v44, 17  ;;  %v1606_v58 = vsub.s32 (!%p166_p9), 2, %v1589_v43  ;;  %vm305_vm1 = vcmp.lt.s32.totalorder (!%p166_p9), %v1591_v44, 16 }
  0x13   : > { %248 = vperm.xlu1 (!%p166_p9), %1298, %v1201_v2   ;;  %v1220_v21 = vld [vmem:[%s1792_s0 + $0x88] sm:$0xff] (!%p166_p9)  ;;  %v1224_v22 = vld [vmem:[%s1792_s0 + $0xa0] sm:$0xff] (!%p166_p9)  ;;  %v1222_v23 = vld [vmem:[%s1792_s0 + $0x98] sm:$0xff] (!%p166_p9)  ;;  %vm403_vm2 = vcmp.lt.s32.totalorder (!%p166_p9), %v1591_v44, 15  ;;  %vm501_vm3 = vcmp.lt.s32.totalorder (!%p166_p9), %v1591_v44, 1  ;;  %vm715_vm4 = vcmp.lt.s32.totalorder (!%p166_p9), %v1591_v44, 127 }
  0x14   : > { %v1226_v24 = vld [vmem:[%s1792_s0 + $0xb0] sm:$0xff] (!%p166_p9)  ;;  %v1225_v25 = vld [vmem:[%s1792_s0 + $0xa8] sm:$0xff] (!%p166_p9)  ;;  %v1229_v26 = vld [vmem:[%s1792_s0 + $0xc0] sm:$0xff] (!%p166_p9)  ;;  %vm813_vm5 = vcmp.lt.s32.totalorder (!%p166_p9), %v1591_v44, 113  ;;  %vm911_vm6 = vcmp.lt.s32.totalorder (!%p166_p9), %v1591_v44, 112  ;;  %vm1009_vm7 = vcmp.lt.s32.totalorder (!%p166_p9), %v1591_v44, 111 }
  0x15   : > { %s192_s29 = scalar_select %p191_p10, %s1421_s19, 1  ;;  %v1227_v27 = vld [vmem:[%s1792_s0 + $0xb8] sm:$0xff]  ;;  %v1231_v28 = vld [vmem:[%s1792_s0 + $0xd0] sm:$0xff]  ;;  %v1230_v29 = vld [vmem:[%s1792_s0 + $0xc8] sm:$0xff] }
  0x16   : > { %v1234_v30 = vld [vmem:[%s1792_s0 + $0xe0] sm:$0xff]  ;;  %v1232_v31 = vld [vmem:[%s1792_s0 + $0xd8] sm:$0xff]  ;;  %v1236_v32 = vld [vmem:[%s1792_s0 + $0xf0] sm:$0xff]  ;;  %s188_s30 = sand.u32 1, %s1355_s16   ;;  %s1374_s13 = smov [#allocation2]  }
  0x17   : > { %s1248_s6 = sshll.u32 %s192_s29, 3  ;;  %286 = vperm.xlu1 %1298, %v1203_v4   ;;  %v1235_v33 = vld [vmem:[%s1792_s0 + $0xe8] sm:$0xff]  ;;  %v1239_v34 = vld [vmem:[%s1792_s0 + $0x100] sm:$0xff]  ;;  %v1237_v35 = vld [vmem:[%s1792_s0 + $0xf8] sm:$0xff]  ;;  %s1197_s5 = sshll.u32 %s188_s30, 4 }
  0x18   : > { %s195_s9 = scalar_lea.vmem %s1795_s3, %s1248_s6  ;;  %v1241_v36 = vld [vmem:[%s1792_s0 + $0x110] sm:$0xff]  ;;  %v1240_v37 = vld [vmem:[%s1792_s0 + $0x108] sm:$0xff]  ;;  %v196_v38 = vld [vmem:[%s1793_s1] sm:$0xff]  ;;  %s1249_s6 = sshll.u32 %s1421_s19, 8 }
  0x19   : > { %v1459_v3 = vld [vmem:[%s195_s9] sm:$0xff]  ;;  %v1242_v39 = vld [vmem:[%s1792_s0 + $0x118] sm:$0xff]  ;;  %v1200_v40 = vld [vmem:[%s1793_s1 + $0x8] sm:$0xff]  ;;  %s1120_s19 = scalar_lea.sflag [#allocation3], %s188_s30  ;;  %s1305_s14 = sshll.u32 %s1374_s13, 4  ;;  %s1306_s14 = int_to_ptr.vmem [resolvable:$false] %s1305_s14 }
  0x1a   : > { %203 = vrot.lane.b32.xlu0 %v1459_v3, %s1366_s10  ;;  %v1467_v5 = vcombine.high %v1459_v3, %v1459_v3  ;;  %v212_v47 = vld [vmem:[%s1794_s2] ss:$8 sm:$0x3]  ;;  %v1204_v63 = vld [vmem:[%s1794_s2 + $0x1] ss:$8 sm:$0x3] }
  0x1b   : > { %301 = vrot.lane.b32.xlu1 %v1459_v3, %s1367_s20  ;;  %v217_v50 = vrot.slane %v212_v47, %v1594_v45  ;;  %v221_v51 = vrot.slane %v212_v47, %v1597_v46  ;;  %v1209_v41 = vld [vmem:[%s1794_s2 + $0x2] ss:$8 sm:$0x3] }
  0x1e   : > { %205 = vrot.lane.b32.xlu0 %v1467_v5, %s1366_s10  ;;  %s1371_s10 = smov 113  }
  0x1f   : > { %327 = vperm.xlu1 %1298, %v1205_v7   ;;  %v1618_v7 = vsub.s32 3, %v1589_v43 }
  0x22   : > { %267 = vperm.xlu0 %1299, %v1202_v6  }
  0x23   : > { %365 = vperm.xlu1 %1298, %v1207_v8   ;;  %v314_v8 = vrot.slane %v1204_v63, %v1594_v45 }
  0x26   : > { %303 = vrot.lane.b32.xlu0 %v1467_v5, %s1367_s20  ;;  %s1307_s20 = scalar_lea.vmem %s1306_s14, 512 }
  0x27   : > { %399 = vrot.lane.b32.xlu1 %v1459_v3, %s1368_s7 }
  0x2a   : > { %346 = vperm.xlu0 %1299, %v1206_v9   ;;  %v318_v9 = vrot.slane %v1204_v63, %v1597_v46 }
  0x2b   : > { %425 = vperm.xlu1 %1298, %v1210_v11  }
  0x2e   : > { %384 = vperm.xlu0 %1299, %v1208_v10  }
  0x2f   : > { %463 = vperm.xlu1 %1298, %v1212_v12  }
  0x32   : > { %401 = vrot.lane.b32.xlu0 %v1467_v5, %s1368_s7  ;;  %s190_s7 = scalar_lea.vmem [#allocation2], %s1197_s5 }
  0x33   : > { %497 = vrot.lane.b32.xlu1 %v1459_v3, %s1369_s22  ;;  %s1134_s8 = sshll.u32 %s190_s7, 4  ;;  %s1750_s8 = int_to_ptr.vmem [resolvable:$true] %s1134_s8 }
  0x34   : > { %s1301_s12 = scalar_lea.vmem %s1750_s8, 256  ;;  %p1308_p0 = scmp.lt.s32.totalorder %s1750_s8, %s1306_s14 }
  0x35   : > { %p1302_p11 = scmp.ne.s32.totalorder %s1750_s8, %s1301_s12  ;;  %p1309_p1 = scmp.lt.s32.totalorder %s1307_s20, %s1301_s12 }
  0x36   : > { %444 = vperm.xlu0 %1299, %v1211_v13  }
  0x37   : > { %523 = vperm.xlu1 %1298, %v1215_v15   ;;  %p1303_p12 = pnand %p1302_p11, %p1438_p5  ;;  %p1310_p2 = por %p1309_p1, %p1308_p0 }
  0x39   : > { %p1304_p13 = pneg %p1303_p12 }
  0x3a   : > { %482 = vperm.xlu0 %1299, %v1213_v14  }
  0x3b   : > { %561 = vperm.xlu1 %1298, %v1217_v16   ;;  %p1311_p3 = pnand %p1310_p2, %p1304_p13 }
  0x3e   : > { %499 = vrot.lane.b32.xlu0 %v1467_v5, %s1369_s22 }
  0x3f   : > { %599 = vperm.xlu1 %1298, %v1219_v18  }
  0x42   : > { %542 = vperm.xlu0 %1299, %v1216_v17  }
  0x43   : > { %657 = vperm.xlu1 %1298, %v1221_v20  }
  0x46   : > { %580 = vperm.xlu0 %1299, %v1218_v19  }
  0x47   : > { %737 = vperm.xlu1 %1298, %v1224_v22  }
  0x4a   : > { %628 = vperm.xlu0 %1299, %v1220_v21  }
  0x4b   : > { %713 = vrot.lane.b32.xlu1 %v1467_v5, %s1370_s27 }
  0x4e   : > { %686 = vperm.xlu0 %1299, %v1222_v23  }
  0x4f   : > { %775 = vperm.xlu1 %1298, %v1226_v24  }
  0x52   : > { %711 = vrot.lane.b32.xlu0 %v1459_v3, %s1370_s27 }
  0x53   : > { %835 = vperm.xlu1 %1298, %v1229_v26  }
  0x56   : > { %756 = vperm.xlu0 %1299, %v1225_v25  }
  0x57   : > { %811 = vrot.lane.b32.xlu1 %v1467_v5, %s1371_s10 }
  0x5a   : > { %794 = vperm.xlu0 %1299, %v1227_v27  }
  0x5b   : > { %873 = vperm.xlu1 %1298, %v1231_v28  }
  0x5e   : > { %809 = vrot.lane.b32.xlu0 %v1459_v3, %s1371_s10 }
  0x5f   : > { %933 = vperm.xlu1 %1298, %v1234_v30  }
  0x62   : > { %854 = vperm.xlu0 %1299, %v1230_v29  }
  0x63   : > { %909 = vrot.lane.b32.xlu1 %v1467_v5, %s1372_s28 }
  0x66   : > { %892 = vperm.xlu0 %1299, %v1232_v31  }
  0x67   : > { %971 = vperm.xlu1 %1298, %v1236_v32  }
  0x6a   : > { %907 = vrot.lane.b32.xlu0 %v1459_v3, %s1372_s28 }
  0x6b   : > { %1031 = vperm.xlu1 %1298, %v1239_v34  }
  0x6e   : > { %952 = vperm.xlu0 %1299, %v1235_v33  }
  0x6f   : > { %1007 = vrot.lane.b32.xlu1 %v1467_v5, %s1373_s11 }
  0x72   : > { %990 = vperm.xlu0 %1299, %v1237_v35  }
  0x73   : > { %1069 = vperm.xlu1 %1298, %v1241_v36  }
  0x76   : > { %1005 = vrot.lane.b32.xlu0 %v1459_v3, %s1373_s11  ;;  %s1748_s11 = scalar_lea.hbm %s1796_s4, %s1249_s6 }
  0x77   : > { %1105 = vperm.xlu1 %1298, %v196_v38  }
  0x7a   : > { %1050 = vperm.xlu0 %1299, %v1240_v37  }
  0x7e   : > { %1088 = vperm.xlu0 %1299, %v1242_v39  }
  0x82   : > { %1112 = vperm.xlu0 %1299, %v1200_v40  }
  0x8c   : > { %v204_v42 = vpop.permute.xlu0 %203 }
  0x8e   : > { %v230_v48 = vpop.permute.xlu1 %229 }
  0x90   : > { %v206_v49 = vpop.permute.xlu0 %205 }
  0x91   : > { %v210_v52 = vsel %vm209_vm0, %v204_v42, %v206_v49  ;;  %v211_v53 = vsel %vm209_vm0, %v206_v49, %v204_v42 }
  0x92   : > { %v249_v54 = vpop.permute.xlu1 %248  ;;  %v224_v55 = vmul.f32 %v217_v50, %v211_v53  ;;  %v225_v56 = vmul.f32 %v221_v51, %v210_v52  ;;  %v412_v53 = vrot.slane %v1209_v41, %v1594_v45 }
  0x94   : > { %v235_v59 = vrot.slane %v224_v55, %v1594_v45  ;;  %v239_v60 = vrot.slane %v225_v56, %v1594_v45  ;;  %v254_v61 = vrot.slane %v224_v55, %v1597_v46  ;;  %v258_v62 = vrot.slane %v225_v56, %v1597_v46 }
  0x95   : > { %v273_v4 = vrot.slane %v224_v55, %v1606_v58  ;;  %v277_v5 = vrot.slane %v225_v56, %v1606_v58  ;;  %v292_v18 = vrot.slane %v224_v55, %v1618_v7  ;;  %v296_v19 = vrot.slane %v225_v56, %v1618_v7 }
  0x96   : > { %v287_v57 = vpop.permute.xlu1 %286  ;;  %v259_v1 = vmul.f32 %v254_v61, %v249_v54  ;;  %v260_v2 = vmul.f32 %v258_v62, %v249_v54  ;;  %v240_v10 = vmul.f32 %v235_v59, %v230_v48  ;;  %v241_v11 = vmul.f32 %v239_v60, %v230_v48 }
  0x97   : > { %v297_v27 = vmul.f32 %v292_v18, %v287_v57  ;;  %v298_v28 = vmul.f32 %v296_v19, %v287_v57  ;;  %v416_v54 = vrot.slane %v1209_v41, %v1597_v46 }
  0x98   : > { %v261_v15 = vadd.f32 %v259_v1, %v240_v10  ;;  %v262_v16 = vadd.f32 %v260_v2, %v241_v11 }
  0x9a   : > { %v302_v0 = vpop.permute.xlu1 %301 }
  0x9e   : > { %v328_v14 = vpop.permute.xlu1 %327 }
  0xa1   : > { %v268_v6 = vpop.permute.xlu0 %267 }
  0xa2   : > { %v278_v12 = vmul.f32 %v273_v4, %v268_v6  ;;  %v279_v13 = vmul.f32 %v277_v5, %v268_v6  ;;  %v366_v26 = vpop.permute.xlu1 %365 }
  0xa4   : > { %v280_v22 = vadd.f32 %v278_v12, %v261_v15  ;;  %v281_v23 = vadd.f32 %v279_v13, %v262_v16 }
  0xa5   : > { %v304_v17 = vpop.permute.xlu0 %303 }
  0xa6   : > { %v306_v20 = vsel %vm305_vm1, %v302_v0, %v304_v17  ;;  %v307_v21 = vsel %vm305_vm1, %v304_v17, %v302_v0  ;;  %v299_v34 = vadd.f32 %v297_v27, %v280_v22  ;;  %v300_v35 = vadd.f32 %v298_v28, %v281_v23  ;;  %v400_v40 = vpop.permute.xlu1 %399 }
  0xa7   : > { %v321_v24 = vmul.f32 %v314_v8, %v307_v21  ;;  %v322_v25 = vmul.f32 %v318_v9, %v306_v20  ;;  %v1214_v21 = vld [vmem:[%s1794_s2 + $0x3] ss:$8 sm:$0x3] }
  0xa9   : > { %v333_v29 = vrot.slane %v321_v24, %v1594_v45  ;;  %v337_v30 = vrot.slane %v322_v25, %v1594_v45  ;;  %v347_v31 = vpop.permute.xlu0 %346  ;;  %v352_v32 = vrot.slane %v321_v24, %v1597_v46  ;;  %v356_v33 = vrot.slane %v322_v25, %v1597_v46 }
  0xaa   : > { %v371_v38 = vrot.slane %v321_v24, %v1606_v58  ;;  %v375_v39 = vrot.slane %v322_v25, %v1606_v58  ;;  %v426_v55 = vpop.permute.xlu1 %425  ;;  %v390_v60 = vrot.slane %v321_v24, %v1618_v7  ;;  %v394_v61 = vrot.slane %v322_v25, %v1618_v7 }
  0xab   : > { %v338_v36 = vmul.f32 %v333_v29, %v328_v14  ;;  %v339_v37 = vmul.f32 %v337_v30, %v328_v14  ;;  %v357_v48 = vmul.f32 %v352_v32, %v347_v31  ;;  %v358_v49 = vmul.f32 %v356_v33, %v347_v31 }
  0xac   : > { %v376_v56 = vmul.f32 %v371_v38, %v366_v26  ;;  %v377_v57 = vmul.f32 %v375_v39, %v366_v26  ;;  %v510_v29 = vrot.slane %v1214_v21, %v1594_v45  ;;  %v514_v30 = vrot.slane %v1214_v21, %v1597_v46 }
  0xad   : > { %v340_v42 = vadd.f32 %v338_v36, %v299_v34  ;;  %v341_v47 = vadd.f32 %v339_v37, %v300_v35  ;;  %v385_v50 = vpop.permute.xlu0 %384  ;;  %v608_v37 = vsub.s32 4, %v1589_v43 }
  0xae   : > { %v464_v5 = vpop.permute.xlu1 %463  ;;  %v395_v6 = vmul.f32 %v390_v60, %v385_v50  ;;  %v396_v8 = vmul.f32 %v394_v61, %v385_v50 }
  0xaf   : > { %v359_v51 = vadd.f32 %v357_v48, %v340_v42  ;;  %v360_v52 = vadd.f32 %v358_v49, %v341_v47 }
  0xb1   : > { %v402_v59 = vpop.permute.xlu0 %401  ;;  %v378_v0 = vadd.f32 %v376_v56, %v359_v51  ;;  %v379_v1 = vadd.f32 %v377_v57, %v360_v52  ;;  %v605_v51 = vrot.slane %v1459_v3, %v1594_v45  ;;  %v637_v52 = vsub.s32 5, %v1589_v43 }
  0xb2   : > { %v404_v62 = vsel %vm403_vm2, %v400_v40, %v402_v59  ;;  %v405_v63 = vsel %vm403_vm2, %v402_v59, %v400_v40  ;;  %v498_v20 = vpop.permute.xlu1 %497  ;;  %v609_v56 = vrot.slane %v1459_v3, %v608_v37 }
  0xb3   : > { %v419_v2 = vmul.f32 %v412_v53, %v405_v63  ;;  %v420_v4 = vmul.f32 %v416_v54, %v404_v62  ;;  %v397_v14 = vadd.f32 %v395_v6, %v378_v0  ;;  %v398_v15 = vadd.f32 %v396_v8, %v379_v1 }
  0xb4   : > { %v634_v6 = vrot.slane %v1459_v3, %v1597_v46  ;;  %v638_v8 = vrot.slane %v1459_v3, %v637_v52 }
  0xb5   : > { %v431_v9 = vrot.slane %v419_v2, %v1594_v45  ;;  %v435_v10 = vrot.slane %v420_v4, %v1594_v45  ;;  %v445_v11 = vpop.permute.xlu0 %444  ;;  %v450_v12 = vrot.slane %v419_v2, %v1597_v46  ;;  %v454_v13 = vrot.slane %v420_v4, %v1597_v46 }
  0xb6   : > { %v469_v18 = vrot.slane %v419_v2, %v1606_v58  ;;  %v473_v19 = vrot.slane %v420_v4, %v1606_v58  ;;  %v524_v33 = vpop.permute.xlu1 %523  ;;  %v488_v34 = vrot.slane %v419_v2, %v1618_v7  ;;  %v492_v35 = vrot.slane %v420_v4, %v1618_v7 }
  0xb7   : > { %v436_v16 = vmul.f32 %v431_v9, %v426_v55  ;;  %v437_v17 = vmul.f32 %v435_v10, %v426_v55  ;;  %v455_v24 = vmul.f32 %v450_v12, %v445_v11  ;;  %v456_v25 = vmul.f32 %v454_v13, %v445_v11 }
  0xb8   : > { %v474_v31 = vmul.f32 %v469_v18, %v464_v5  ;;  %v475_v32 = vmul.f32 %v473_v19, %v464_v5  ;;  %v615_v4 = vrot.slane %v605_v51, %v1594_v45  ;;  %v666_v5 = vsub.s32 6, %v1589_v43 }
  0xb9   : > { %v438_v22 = vadd.f32 %v436_v16, %v397_v14  ;;  %v439_v23 = vadd.f32 %v437_v17, %v398_v15  ;;  %v483_v26 = vpop.permute.xlu0 %482  ;;  %v619_v14 = vrot.slane %v609_v56, %v1594_v45  ;;  %v663_v17 = vrot.slane %v1459_v3, %v1606_v58 }
  0xba   : > { %v493_v48 = vmul.f32 %v488_v34, %v483_v26  ;;  %v494_v49 = vmul.f32 %v492_v35, %v483_v26  ;;  %v562_v50 = vpop.permute.xlu1 %561  ;;  %v695_v26 = vsub.s32 7, %v1589_v43  ;;  %v1223_v43 = vld [vmem:[%s1794_s2 + $0x5] ss:$8 sm:$0x3] }
  0xbb   : > { %v457_v27 = vadd.f32 %v455_v24, %v438_v22  ;;  %v458_v28 = vadd.f32 %v456_v25, %v439_v23  ;;  %v667_v23 = vrot.slane %v1459_v3, %v666_v5  ;;  %v644_v24 = vrot.slane %v634_v6, %v1597_v46 }
  0xbc   : > { %v648_v25 = vrot.slane %v638_v8, %v1597_v46  ;;  %v724_v52 = vrot.slane %v1223_v43, %v1594_v45 }
  0xbd   : > { %v500_v36 = vpop.permute.xlu0 %499  ;;  %v476_v38 = vadd.f32 %v474_v31, %v457_v27  ;;  %v477_v39 = vadd.f32 %v475_v32, %v458_v28  ;;  %v677_v37 = vrot.slane %v667_v23, %v1606_v58 }
  0xbe   : > { %v502_v40 = vsel %vm501_vm3, %v498_v20, %v500_v36  ;;  %v503_v41 = vsel %vm501_vm3, %v500_v36, %v498_v20  ;;  %v600_v2 = vpop.permute.xlu1 %599  ;;  %v673_v36 = vrot.slane %v663_v17, %v1606_v58 }
  0xbf   : > { %v517_v42 = vmul.f32 %v510_v29, %v503_v41  ;;  %v518_v47 = vmul.f32 %v514_v30, %v502_v40  ;;  %v495_v57 = vadd.f32 %v493_v48, %v476_v38  ;;  %v496_v59 = vadd.f32 %v494_v49, %v477_v39 }
  0xc0   : > { %v620_v32 = vmul.f32 %v615_v4, %v600_v2  ;;  %v692_v39 = vrot.slane %v1459_v3, %v1618_v7  ;;  %v696_v40 = vrot.slane %v1459_v3, %v695_v26 }
  0xc1   : > { %v529_v53 = vrot.slane %v517_v42, %v1594_v45  ;;  %v533_v54 = vrot.slane %v518_v47, %v1594_v45  ;;  %v543_v55 = vpop.permute.xlu0 %542  ;;  %v548_v60 = vrot.slane %v517_v42, %v1597_v46  ;;  %v552_v61 = vrot.slane %v518_v47, %v1597_v46 }
  0xc2   : > { %v567_v62 = vrot.slane %v517_v42, %v1606_v58  ;;  %v571_v63 = vrot.slane %v518_v47, %v1606_v58  ;;  %v586_v15 = vrot.slane %v517_v42, %v1618_v7  ;;  %v590_v16 = vrot.slane %v518_v47, %v1618_v7  ;;  %v658_v22 = vpop.permute.xlu1 %657 }
  0xc3   : > { %v534_v0 = vmul.f32 %v529_v53, %v524_v33  ;;  %v535_v1 = vmul.f32 %v533_v54, %v524_v33  ;;  %v553_v11 = vmul.f32 %v548_v60, %v543_v55  ;;  %v554_v12 = vmul.f32 %v552_v61, %v543_v55 }
  0xc4   : > { %v572_v18 = vmul.f32 %v567_v62, %v562_v50  ;;  %v573_v19 = vmul.f32 %v571_v63, %v562_v50  ;;  %v621_v33 = vmul.f32 %v619_v14, %v600_v2  ;;  %v728_v53 = vrot.slane %v1223_v43, %v1597_v46 }
  0xc5   : > { %v536_v9 = vadd.f32 %v534_v0, %v495_v57  ;;  %v537_v10 = vadd.f32 %v535_v1, %v496_v59  ;;  %v581_v13 = vpop.permute.xlu0 %580  ;;  %v678_v55 = vmul.f32 %v673_v36, %v658_v22  ;;  %v679_v3 = vmul.f32 %v677_v37, %v658_v22 }
  0xc6   : > { %v591_v29 = vmul.f32 %v586_v15, %v581_v13  ;;  %v592_v30 = vmul.f32 %v590_v16, %v581_v13  ;;  %v738_v38 = vpop.permute.xlu1 %737  ;;  %v702_v56 = vrot.slane %v692_v39, %v1618_v7  ;;  %v706_v57 = vrot.slane %v696_v40, %v1618_v7 }
  0xc7   : > { %v555_v20 = vadd.f32 %v553_v11, %v536_v9  ;;  %v556_v21 = vadd.f32 %v554_v12, %v537_v10 }
  0xc9   : > { %v574_v27 = vadd.f32 %v572_v18, %v555_v20  ;;  %v575_v28 = vadd.f32 %v573_v19, %v556_v21  ;;  %v629_v31 = vpop.permute.xlu0 %628  ;;  %v1228_v19 = vld [vmem:[%s1794_s2 + $0x6] ss:$8 sm:$0x3] }
  0xca   : > { %v649_v47 = vmul.f32 %v644_v24, %v629_v31  ;;  %v650_v48 = vmul.f32 %v648_v25, %v629_v31  ;;  %v714_v54 = vpop.permute.xlu1 %713 }
  0xcb   : > { %v593_v34 = vadd.f32 %v591_v29, %v574_v27  ;;  %v594_v35 = vadd.f32 %v592_v30, %v575_v28  ;;  %v822_v27 = vrot.slane %v1228_v19, %v1594_v45  ;;  %v826_v28 = vrot.slane %v1228_v19, %v1597_v46 }
  0xcd   : > { %v622_v41 = vadd.f32 %v620_v32, %v593_v34  ;;  %v623_v42 = vadd.f32 %v621_v33, %v594_v35  ;;  %v687_v49 = vpop.permute.xlu0 %686 }
  0xce   : > { %v776_v2 = vpop.permute.xlu1 %775  ;;  %v707_v4 = vmul.f32 %v702_v56, %v687_v49  ;;  %v708_v5 = vmul.f32 %v706_v57, %v687_v49 }
  0xcf   : > { %v651_v50 = vadd.f32 %v649_v47, %v622_v41  ;;  %v652_v51 = vadd.f32 %v650_v48, %v623_v42 }
  0xd1   : > { %v712_v59 = vpop.permute.xlu0 %711  ;;  %v680_v62 = vadd.f32 %v678_v55, %v651_v50  ;;  %v681_v63 = vadd.f32 %v679_v3, %v652_v51 }
  0xd2   : > { %v716_v60 = vsel %vm715_vm4, %v712_v59, %v714_v54  ;;  %v717_v61 = vsel %vm715_vm4, %v714_v54, %v712_v59  ;;  %v836_v18 = vpop.permute.xlu1 %835  ;;  %v1233_v59 = vld [vmem:[%s1794_s2 + $0x7] ss:$8 sm:$0x3] }
  0xd3   : > { %v731_v0 = vmul.f32 %v724_v52, %v716_v60  ;;  %v732_v1 = vmul.f32 %v728_v53, %v717_v61  ;;  %v709_v12 = vadd.f32 %v707_v4, %v680_v62  ;;  %v710_v13 = vadd.f32 %v708_v5, %v681_v63 }
  0xd4   : > { %v920_v4 = vrot.slane %v1233_v59, %v1594_v45  ;;  %v924_v5 = vrot.slane %v1233_v59, %v1597_v46 }
  0xd5   : > { %v743_v6 = vrot.slane %v731_v0, %v1594_v45  ;;  %v747_v8 = vrot.slane %v732_v1, %v1594_v45  ;;  %v757_v9 = vpop.permute.xlu0 %756  ;;  %v762_v10 = vrot.slane %v731_v0, %v1597_v46  ;;  %v766_v11 = vrot.slane %v732_v1, %v1597_v46 }
  0xd6   : > { %v781_v16 = vrot.slane %v731_v0, %v1606_v58  ;;  %v785_v17 = vrot.slane %v732_v1, %v1606_v58  ;;  %v812_v29 = vpop.permute.xlu1 %811  ;;  %v800_v33 = vrot.slane %v731_v0, %v1618_v7  ;;  %v804_v34 = vrot.slane %v732_v1, %v1618_v7 }
  0xd7   : > { %v748_v14 = vmul.f32 %v743_v6, %v738_v38  ;;  %v749_v15 = vmul.f32 %v747_v8, %v738_v38  ;;  %v767_v22 = vmul.f32 %v762_v10, %v757_v9  ;;  %v768_v23 = vmul.f32 %v766_v11, %v757_v9 }
  0xd8   : > { %v786_v30 = vmul.f32 %v781_v16, %v776_v2  ;;  %v787_v31 = vmul.f32 %v785_v17, %v776_v2 }
  0xd9   : > { %v750_v20 = vadd.f32 %v748_v14, %v709_v12  ;;  %v751_v21 = vadd.f32 %v749_v15, %v710_v13  ;;  %v795_v24 = vpop.permute.xlu0 %794 }
  0xda   : > { %v874_v43 = vpop.permute.xlu1 %873  ;;  %v805_v41 = vmul.f32 %v800_v33, %v795_v24  ;;  %v806_v42 = vmul.f32 %v804_v34, %v795_v24  ;;  %v1238_v34 = vld [vmem:[%s1794_s2 + $0x10] ss:$8 sm:$0x3] }
  0xdb   : > { %v769_v25 = vadd.f32 %v767_v22, %v750_v20  ;;  %v770_v26 = vadd.f32 %v768_v23, %v751_v21 }
  0xdd   : > { %v810_v32 = vpop.permute.xlu0 %809  ;;  %v788_v37 = vadd.f32 %v786_v30, %v769_v25  ;;  %v789_v38 = vadd.f32 %v787_v31, %v770_v26 }
  0xde   : > { %v814_v35 = vsel %vm813_vm5, %v810_v32, %v812_v29  ;;  %v815_v36 = vsel %vm813_vm5, %v812_v29, %v810_v32  ;;  %v934_v57 = vpop.permute.xlu1 %933 }
  0xdf   : > { %v829_v39 = vmul.f32 %v822_v27, %v814_v35  ;;  %v830_v40 = vmul.f32 %v826_v28, %v815_v36  ;;  %v807_v52 = vadd.f32 %v805_v41, %v788_v37  ;;  %v808_v53 = vadd.f32 %v806_v42, %v789_v38 }
  0xe0   : > { %v1018_v41 = vrot.slane %v1238_v34, %v1594_v45  ;;  %v1022_v42 = vrot.slane %v1238_v34, %v1597_v46 }
  0xe1   : > { %v841_v47 = vrot.slane %v829_v39, %v1594_v45  ;;  %v845_v48 = vrot.slane %v830_v40, %v1594_v45  ;;  %v855_v49 = vpop.permute.xlu0 %854  ;;  %v860_v50 = vrot.slane %v829_v39, %v1597_v46  ;;  %v864_v51 = vrot.slane %v830_v40, %v1597_v46 }
  0xe2   : > { %v879_v3 = vrot.slane %v829_v39, %v1606_v58  ;;  %v883_v56 = vrot.slane %v830_v40, %v1606_v58  ;;  %v910_v6 = vpop.permute.xlu1 %909  ;;  %v898_v11 = vrot.slane %v829_v39, %v1618_v7  ;;  %v902_v12 = vrot.slane %v830_v40, %v1618_v7 }
  0xe3   : > { %v846_v54 = vmul.f32 %v841_v47, %v836_v18  ;;  %v847_v55 = vmul.f32 %v845_v48, %v836_v18  ;;  %v865_v62 = vmul.f32 %v860_v50, %v855_v49  ;;  %v866_v63 = vmul.f32 %v864_v51, %v855_v49 }
  0xe4   : > { %v884_v8 = vmul.f32 %v879_v3, %v874_v43  ;;  %v885_v9 = vmul.f32 %v883_v56, %v874_v43 }
  0xe5   : > { %v848_v60 = vadd.f32 %v846_v54, %v807_v52  ;;  %v849_v61 = vadd.f32 %v847_v55, %v808_v53  ;;  %v893_v0 = vpop.permute.xlu0 %892 }
  0xe6   : > { %v972_v19 = vpop.permute.xlu1 %971  ;;  %v903_v20 = vmul.f32 %v898_v11, %v893_v0  ;;  %v904_v21 = vmul.f32 %v902_v12, %v893_v0 }
  0xe7   : > { %v867_v1 = vadd.f32 %v865_v62, %v848_v60  ;;  %v868_v2 = vadd.f32 %v866_v63, %v849_v61 }
  0xe9   : > { %v908_v10 = vpop.permute.xlu0 %907  ;;  %v886_v15 = vadd.f32 %v884_v8, %v867_v1  ;;  %v887_v16 = vadd.f32 %v885_v9, %v868_v2 }
  0xea   : > { %v912_v13 = vsel %vm911_vm6, %v908_v10, %v910_v6  ;;  %v913_v14 = vsel %vm911_vm6, %v910_v6, %v908_v10  ;;  %v1032_v33 = vpop.permute.xlu1 %1031 }
  0xeb   : > { %v927_v17 = vmul.f32 %v920_v4, %v912_v13  ;;  %v928_v18 = vmul.f32 %v924_v5, %v913_v14  ;;  %v905_v27 = vadd.f32 %v903_v20, %v886_v15  ;;  %v906_v28 = vadd.f32 %v904_v21, %v887_v16 }
  0xed   : > { %v939_v22 = vrot.slane %v927_v17, %v1594_v45  ;;  %v943_v23 = vrot.slane %v928_v18, %v1594_v45  ;;  %v953_v24 = vpop.permute.xlu0 %952  ;;  %v958_v25 = vrot.slane %v927_v17, %v1597_v46  ;;  %v962_v26 = vrot.slane %v928_v18, %v1597_v46 }
  0xee   : > { %v977_v31 = vrot.slane %v927_v17, %v1606_v58  ;;  %v981_v32 = vrot.slane %v928_v18, %v1606_v58  ;;  %v1008_v49 = vpop.permute.xlu1 %1007  ;;  %v996_v50 = vrot.slane %v927_v17, %v1618_v7  ;;  %v1000_v51 = vrot.slane %v928_v18, %v1618_v7 }
  0xef   : > { %v944_v29 = vmul.f32 %v939_v22, %v934_v57  ;;  %v945_v30 = vmul.f32 %v943_v23, %v934_v57  ;;  %v963_v37 = vmul.f32 %v958_v25, %v953_v24  ;;  %v964_v38 = vmul.f32 %v962_v26, %v953_v24 }
  0xf0   : > { %v982_v47 = vmul.f32 %v977_v31, %v972_v19  ;;  %v983_v48 = vmul.f32 %v981_v32, %v972_v19 }
  0xf1   : > { %v946_v35 = vadd.f32 %v944_v29, %v905_v27  ;;  %v947_v36 = vadd.f32 %v945_v30, %v906_v28  ;;  %v991_v39 = vpop.permute.xlu0 %990 }
  0xf2   : > { %v1001_v57 = vmul.f32 %v996_v50, %v991_v39  ;;  %v1002_v59 = vmul.f32 %v1000_v51, %v991_v39 }
  0xf3   : > { %v965_v40 = vadd.f32 %v963_v37, %v946_v35  ;;  %v966_v43 = vadd.f32 %v964_v38, %v947_v36 }
  0xf5   : > { %v1006_v52 = vpop.permute.xlu0 %1005  ;;  %v984_v53 = vadd.f32 %v982_v47, %v965_v40  ;;  %v985_v54 = vadd.f32 %v983_v48, %v966_v43 }
  0xf6   : > { %v1010_v55 = vsel %vm1009_vm7, %v1006_v52, %v1008_v49  ;;  %v1011_v3 = vsel %vm1009_vm7, %v1008_v49, %v1006_v52 }
  0xf7   : > { %v1025_v44 = vmul.f32 %v1018_v41, %v1010_v55  ;;  %v1026_v56 = vmul.f32 %v1022_v42, %v1011_v3  ;;  %v1003_v63 = vadd.f32 %v1001_v57, %v984_v53  ;;  %v1004_v0 = vadd.f32 %v1002_v59, %v985_v54 }
  0xf9   : > { %v1037_v60 = vrot.slane %v1025_v44, %v1594_v45  ;;  %v1041_v61 = vrot.slane %v1026_v56, %v1594_v45  ;;  %v1051_v62 = vpop.permute.xlu0 %1050  ;;  %v1056_v1 = vrot.slane %v1025_v44, %v1597_v46  ;;  %v1060_v2 = vrot.slane %v1026_v56, %v1597_v46  ;;  %v1070_v45 = vpop.permute.xlu1 %1069 }
  0xfa   : > { %v1075_v4 = vrot.slane %v1025_v44, %v1606_v58  ;;  %v1079_v5 = vrot.slane %v1026_v56, %v1606_v58  ;;  %v1094_v13 = vrot.slane %v1025_v44, %v1618_v7  ;;  %v1098_v14 = vrot.slane %v1026_v56, %v1618_v7 }
  0xfb   : > { %v1042_v6 = vmul.f32 %v1037_v60, %v1032_v33  ;;  %v1043_v8 = vmul.f32 %v1041_v61, %v1032_v33  ;;  %v1061_v11 = vmul.f32 %v1056_v1, %v1051_v62  ;;  %v1062_v12 = vmul.f32 %v1060_v2, %v1051_v62 }
  0xfc   : > { %v1080_v46 = vmul.f32 %v1075_v4, %v1070_v45  ;;  %v1081_v16 = vmul.f32 %v1079_v5, %v1070_v45 }
  0xfd   : > { %v1044_v9 = vadd.f32 %v1042_v6, %v1003_v63  ;;  %v1045_v10 = vadd.f32 %v1043_v8, %v1004_v0  ;;  %v1089_v15 = vpop.permute.xlu0 %1088  ;;  %v1106_v24 = vpop.permute.xlu1 %1105 }
  0xfe   : > { %v1099_v20 = vmul.f32 %v1094_v13, %v1089_v15  ;;  %v1100_v21 = vmul.f32 %v1098_v14, %v1089_v15 }
  0xff   : > { %v1063_v17 = vadd.f32 %v1061_v11, %v1044_v9  ;;  %v1064_v58 = vadd.f32 %v1062_v12, %v1045_v10 }
 0x101   : > { %v1082_v18 = vadd.f32 %v1080_v46, %v1063_v17  ;;  %v1083_v19 = vadd.f32 %v1081_v16, %v1064_v58  ;;  %v1113_v26 = vpop.permute.xlu0 %1112 }
 0x103   : > { %v1101_v22 = vadd.f32 %v1099_v20, %v1082_v18  ;;  %v1102_v23 = vadd.f32 %v1100_v21, %v1083_v19 }
 0x105   : > { %v1108_v7 = vmul.f32 %v1106_v24, %v1101_v22  ;;  %v1109_v25 = vmul.f32 %v1106_v24, %v1102_v23 }
 0x107   : > { %v1115_v27 = vadd.f32 %v1113_v26, %v1108_v7  ;;  %v1116_v28 = vadd.f32 %v1113_v26, %v1109_v25 }
 0x109   : > { %1117 = vst [vmem:[%s190_s7] sm:$0xff] %v1115_v27  ;;  %1118 = vst [vmem:[%s190_s7 + $0x8] sm:$0xff] %v1116_v28 }
 0x10a   : > { %1314 = shalt.err (!%p1311_p3)
}
 0x10b   : > { %s1315_s22 = scalar_lea.hbm %s1748_s11, 256  ;;  %s1319_s28 = scalar_lea.hbm %s1796_s4, 512 }
 0x10c   : > { %p1316_p4 = scmp.ne.s32.totalorder %s1748_s11, %s1315_s22  ;;  %p1320_p9 = scmp.lt.u32.totalorder %s1748_s11, %s1796_s4 }
 0x10d   : > { %p1321_p10 = scmp.lt.u32.totalorder %s1319_s28, %s1315_s22  ;;  %p1323_p12 = scmp.lt.u32.totalorder %s1315_s22, %s1748_s11 }
 0x10e   : > { %p1317_p7 = pnand %p1316_p4, %p1438_p5 }
 0x10f   : > { %p1322_p11 = por %p1321_p10, %p1320_p9 }
 0x110   : > { %p1318_p8 = pneg %p1317_p7 }
 0x111   : > { %p1324_p13 = por %p1323_p12, %p1322_p11 }
 0x113   : > { %p1325_p0 = pnand %p1324_p13, %p1318_p8 }
 0x115   : > { %1328 = shalt.err (!%p1325_p0)
}
 0x116   : > { %1250 = dma.vmem_to_hbm [thread:$0]  (%p1438_p5), %s1750_s8, 256, %s1748_s11, %s1120_s19  }
 0x117 PF: > { %p1256_p1 = scmp.ge.s32.totalorder %s1363_s18, 2  ;;  %s1146_s5 = sand.u32 1, %s1351_s15  }
 0x118   : > { %s1147_s6 = scalar_lea.sflag [#allocation3], %s1146_s5 }
 0x119   : > { %p1253_p2 = pnand %p1256_p1, %p1442_p6 }
 0x11b   : > { %1346 = dma.done.wait (!%p1253_p2), %s1147_s6, 256  }
 0x11c   : > { %1348 = vsyncadd (!%p1253_p2), %s1147_s6, 4294967040  ;;  %p14_p3 = scmp.ge.s32.totalorder %s1425_s21, 4   ;;  %s1799_s15 = smov %s1355_s16 }
 0x11d   : > { %s1800_s16 = smov %s1359_s17  ;;  %s1801_s17 = smov %s1436_s24 }
 0x11e   : > { %s1802_s18 = smov %s1425_s21  ;;  %16 = sbr.rel (!%p14_p3) target bundleno = 3 (0x3), region = 114 }
 0x125   :  { %1152 = vsyncpa [#allocation3], 1 }
 0x126   :  { %1154 = vsyncpa [#allocation3 + $0x1], 1 }

</bundles_post_ra>
